<compile_context>
chip_gen: v5e
topology: v5e:2x2
jax: 0.10.0
libtpu: 0.0.40
codegen_flags: <defaults>
</compile_context>

<pallas_src>
import functools

import numpy as np
import jax
import jax.numpy as jnp
from jax.experimental import pallas as pl
from jax.experimental.pallas import tpu as pltpu


# ----------------------------------------------------------------------------
# sincos positional embedding (numpy, matches diffusers / opensora reference)
# ----------------------------------------------------------------------------
def get_1d_sincos_pos_embed_from_grid(embed_dim, pos):
    omega = np.arange(embed_dim // 2, dtype=np.float64)
    omega /= embed_dim / 2.0
    omega = 1.0 / 10000**omega
    pos = pos.reshape(-1)
    out = np.einsum("m,d->md", pos, omega)
    return np.concatenate([np.sin(out), np.cos(out)], axis=1)


def get_2d_sincos_pos_embed_from_grid(embed_dim, grid):
    emb_h = get_1d_sincos_pos_embed_from_grid(embed_dim // 2, grid[0])
    emb_w = get_1d_sincos_pos_embed_from_grid(embed_dim // 2, grid[1])
    return np.concatenate([emb_h, emb_w], axis=1)


def get_2d_sincos_pos_embed(embed_dim, grid_size, base_size=16, interpolation_scale=1.0):
    if isinstance(grid_size, int):
        grid_size = (grid_size, grid_size)
    grid_h = np.arange(grid_size[0], dtype=np.float32) / (grid_size[0] / base_size) / interpolation_scale
    grid_w = np.arange(grid_size[1], dtype=np.float32) / (grid_size[1] / base_size) / interpolation_scale
    grid = np.meshgrid(grid_w, grid_h)  # w goes first (reference convention)
    grid = np.stack(grid, axis=0)
    grid = grid.reshape([2, 1, grid_size[1], grid_size[0]])
    return get_2d_sincos_pos_embed_from_grid(embed_dim, grid)


# ----------------------------------------------------------------------------
# Pallas kernel: row-tiled patch projection (+ bias, optional LN) + pos add
# ----------------------------------------------------------------------------
def _make_kernel(layer_norm, e_dim, tm, n_patches, pos_mode):
    """pos_mode:
       'bcast'  - TM = g*NP, resident (NP, E) pos broadcast over g images
       'slice'  - TM divides NP, resident pos rows sliced by program_id
       'stream' - per-row (TM, E) pos tile DMA'd alongside the patches
    """
    inv_e = 1.0 / float(e_dim)
    g = tm // n_patches if pos_mode == "bcast" else 1
    n_pos_tiles = (n_patches // tm) if pos_mode == "slice" else 1

    def _add_pos(acc, pos_ref):
        if pos_mode == "slice" and n_pos_tiles > 1:
            off = pl.multiple_of((pl.program_id(0) % n_pos_tiles) * tm, tm)
            return acc + pos_ref[pl.ds(off, tm), :].astype(jnp.float32)
        pos = pos_ref[...].astype(jnp.float32)
        if pos_mode == "bcast" and g > 1:
            # layout-preserving reshape: NP % 8 == 0, lane (E) dim untouched
            return (acc.reshape(g, n_patches, e_dim) + pos[None]).reshape(tm, e_dim)
        return acc + pos

    if layer_norm:
        def kernel(xp_ref, w_ref, b_ref, pos_ref, o_ref):
            acc = jnp.dot(xp_ref[...], w_ref[...],
                          preferred_element_type=jnp.float32)
            acc = acc + b_ref[...]
            # two-pass (centered) LayerNorm statistics in f32
            mu = jnp.sum(acc, axis=-1, keepdims=True) * inv_e
            cen = acc - mu
            var = jnp.sum(cen * cen, axis=-1, keepdims=True) * inv_e
            acc = cen * jax.lax.rsqrt(var + 1e-6)
            o_ref[...] = _add_pos(acc, pos_ref).astype(o_ref.dtype)
    else:
        def kernel(xp_ref, w_ref, posb_ref, o_ref):
            # conv bias was folded into the pos table in the wrapper
            acc = jnp.dot(xp_ref[...], w_ref[...],
                          preferred_element_type=jnp.float32)
            o_ref[...] = _add_pos(acc, posb_ref).astype(o_ref.dtype)

    return kernel


def _round_up(x, m):
    return -(-x // m) * m


def _select_row_tile(batch, n_patches, max_rows):
    """Pick TM: either g*NP (g whole images / tile) or a multiple-of-8 divisor
    of NP, preferring the largest tile that still leaves >= 2 grid steps
    (keeps both v7x TensorCores loaded).  Returns 0 if NP admits no 8-aligned
    tiling (caller falls back to the streamed-pos path)."""
    if n_patches % 8 != 0:
        return 0
    m_rows = batch * n_patches
    cands = []
    g = 1
    while g <= batch and g * n_patches <= max_rows:
        if batch % g == 0:
            cands.append(g * n_patches)
        g += 1
    t = 8
    while t <= min(n_patches, max_rows):
        if n_patches % t == 0:
            cands.append(t)
        t += 8
    if not cands:
        return 0
    two_step = [t for t in cands if m_rows // t >= 2]
    return max(two_step) if two_step else max(cands)


@functools.partial(
    jax.jit,
    static_argnames=("patch_size", "layer_norm", "compute_dtype", "out_dtype",
                     "max_rows_per_tile"),
)
def patch_embed_forward(latent, weight, bias, pos_embed, *, patch_size,
                        layer_norm=False, compute_dtype=jnp.bfloat16,
                        out_dtype=None, max_rows_per_tile=1024):
    """latent: (B,C,H,W) NCHW; weight: (E,C,p,p) Conv2d weight; bias: (E,);
    pos_embed: (NP, E).  Returns (B, NP, E) in out_dtype (default latent.dtype).

    Tuning notes: raise max_rows_per_tile (e.g. 2048) on v7x (3.2 TB/s HBM);
    keep it <= ~512 with f32 output on v5e (16 MiB default scoped VMEM)."""
    B, C, H, W = latent.shape
    p = patch_size
    Hp, Wp = H // p, W // p
    NP = Hp * Wp
    E = weight.shape[0]
    K = C * p * p
    M = B * NP
    out_dtype = latent.dtype if out_dtype is None else out_dtype

    # --- glue: patch extraction fused with the compute-dtype cast ---
    # (B,C,H,W) -> (B,C,Hp,p,Wp,p) -> (B,Hp,Wp,C,p,p) -> (B*NP, K)
    xp = (latent.astype(compute_dtype)
          .reshape(B, C, Hp, p, Wp, p)
          .transpose(0, 2, 4, 1, 3, 5)
          .reshape(M, K))
    wk = weight.reshape(E, K).T.astype(compute_dtype)          # (K, E)
    bias_f = bias.astype(jnp.float32)
    pos_dtype = compute_dtype if np.dtype(compute_dtype).itemsize < 4 else jnp.float32
    pos_base = pos_embed.astype(jnp.float32)                   # (NP, E)
    if not layer_norm:
        pos_base = pos_base + bias_f[None, :]                  # fold conv bias

    TM = _select_row_tile(B, NP, max_rows_per_tile)
    if TM > 0:
        pos_mode = "bcast" if TM % NP == 0 else "slice"
        pos_arr = pos_base.astype(pos_dtype)                   # resident (NP, E)
        pos_spec = pl.BlockSpec(pos_arr.shape, lambda i: (0, 0),
                                pipeline_mode=pl.Buffered(1))
        out_rows = M
        pos_resident = True
    else:
        # NP has no multiple-of-8 tiling (e.g. 49): pad rows up to a multiple
        # of TM and *stream* a per-row pos table per tile so VMEM does not
        # scale with the batch.
        pos_mode = "stream"
        tm_cap = max(8, (min(max_rows_per_tile, 512) // 8) * 8)
        TM = tm_cap if M > tm_cap else max(8, _round_up(-(-M // 2), 8))
        out_rows = _round_up(M, TM)
        pos_full = jnp.tile(pos_base, (B, 1))                  # (M, E)
        if out_rows != M:
            xp = jnp.pad(xp, ((0, out_rows - M), (0, 0)))
            pos_full = jnp.pad(pos_full, ((0, out_rows - M), (0, 0)))
        pos_arr = pos_full.astype(pos_dtype)
        pos_spec = pl.BlockSpec((TM, E), lambda i: (i, 0))
        pos_resident = False
    grid_m = out_rows // TM

    in_b = np.dtype(compute_dtype).itemsize
    out_b = np.dtype(out_dtype).itemsize
    pos_b = np.dtype(pos_dtype).itemsize

    # VMEM footprint of one pipelined step (double-buffered xp/out/streamed
    # pos; single-buffered resident tables) -> scoped limit with 2x margin,
    # clamped to [32 MiB, 64 MiB] so it is valid on v5e..v7x.
    vmem_need = (2 * TM * K * in_b + K * E * in_b
                 + (pos_arr.size * pos_b if pos_resident else 2 * TM * E * pos_b)
                 + (E * 4 if layer_norm else 0)
                 + 2 * TM * E * out_b)
    vmem_limit = int(min(64 * 1024 * 1024, max(32 * 1024 * 1024, 2 * vmem_need)))

    cost = pl.CostEstimate(
        flops=2 * M * K * E,
        transcendentals=0,
        bytes_accessed=int(xp.size * in_b + wk.size * in_b
                           + pos_arr.size * pos_b + out_rows * E * out_b),
    )

    if layer_norm:
        inputs = (xp, wk, bias_f.reshape(1, E), pos_arr)
        in_specs = [
            pl.BlockSpec((TM, K), lambda i: (i, 0)),                                  # patches (tiled)
            pl.BlockSpec((K, E), lambda i: (0, 0), pipeline_mode=pl.Buffered(1)),     # weight (resident)
            pl.BlockSpec((1, E), lambda i: (0, 0), pipeline_mode=pl.Buffered(1)),     # bias (resident)
            pos_spec,                                                                 # pos table
        ]
    else:
        inputs = (xp, wk, pos_arr)
        in_specs = [
            pl.BlockSpec((TM, K), lambda i: (i, 0)),
            pl.BlockSpec((K, E), lambda i: (0, 0), pipeline_mode=pl.Buffered(1)),
            pos_spec,
        ]

    out = pl.pallas_call(
        _make_kernel(layer_norm, E, TM, NP, pos_mode),
        out_shape=jax.ShapeDtypeStruct((out_rows, E), out_dtype),
        grid_spec=pltpu.PrefetchScalarGridSpec(
            num_scalar_prefetch=0,
            grid=(grid_m,),
            in_specs=in_specs,
            out_specs=pl.BlockSpec((TM, E), lambda i: (i, 0)),
        ),
        compiler_params=pltpu.CompilerParams(
            dimension_semantics=("parallel",),   # M-tiles independent (v7x 2-TC split)
            vmem_limit_bytes=vmem_limit,
        ),
        cost_estimate=cost,
    )(*inputs)

    if out_rows != M:
        # TODO(synk): the padded-row fallback (NP % 8 != 0) pays one extra copy here.
        out = out[:M]
    return out.reshape(B, NP, E)


# ----------------------------------------------------------------------------
# main
# ----------------------------------------------------------------------------
if __name__ == "__main__":
    def make_inputs(B, C, H, W, p, E, key):
        kx, kw, kb = jax.random.split(key, 3)
        latent = jax.random.normal(kx, (B, C, H, W), dtype=jnp.float32)
        fan_in = C * p * p
        weight = jax.random.normal(kw, (E, C, p, p), dtype=jnp.float32) / np.sqrt(fan_in)
        bias = jax.random.normal(kb, (E,), dtype=jnp.float32) * 0.01
        Hp, Wp = H // p, W // p
        pos = get_2d_sincos_pos_embed(E, (Hp, Wp), base_size=Hp,
                                      interpolation_scale=1).astype(np.float32)
        return latent, weight, bias, jnp.asarray(pos)
        # TODO(synk): dynamic pos_embed regeneration for mismatched H/W stays
        # host-side numpy (same as the PyTorch module); pass the table in here.

    def reference(latent, weight, bias, pos, p, layer_norm):
        B, C, H, W = latent.shape
        Hp, Wp = H // p, W // p
        E = weight.shape[0]
        xp = (latent.reshape(B, C, Hp, p, Wp, p)
              .transpose(0, 2, 4, 1, 3, 5).reshape(B, Hp * Wp, -1))
        proj = xp @ weight.reshape(E, -1).T + bias[None, None, :]
        if layer_norm:
            mu = proj.mean(-1, keepdims=True)
            var = ((proj - mu) ** 2).mean(-1, keepdims=True)
            proj = (proj - mu) / jnp.sqrt(var + 1e-6)
        return proj + pos[None]

    # ---- 1) base config: B=2,C=4,16x16,p=2,E=32 ; bf16 compute, f32 out ----
    lat, w, b, pos = make_inputs(2, 4, 16, 16, 2, 32, jax.random.PRNGKey(0))
    ref = reference(lat, w, b, pos, 2, False)
    out = patch_embed_forward(lat, w, b, pos, patch_size=2, layer_norm=False,
                              compute_dtype=jnp.bfloat16)
    out = jax.block_until_ready(out)
    assert out.shape == (2, 64, 32) and out.dtype == lat.dtype
    np.testing.assert_allclose(np.asarray(out), np.asarray(ref), rtol=5e-2, atol=5e-2)

    # ---- 2) layer_norm=True path (f32 end-to-end, tight tolerance) ----
    ref_ln = reference(lat, w, b, pos, 2, True)
    out_ln = patch_embed_forward(lat, w, b, pos, patch_size=2, layer_norm=True,
                                 compute_dtype=jnp.float32)
    out_ln = jax.block_until_ready(out_ln)
    assert out_ln.shape == (2, 64, 32)
    np.testing.assert_allclose(np.asarray(out_ln), np.asarray(ref_ln),
                               rtol=1e-4, atol=1e-4)

    # ---- 3) multi-image tile (TM = 2*NP) + bf16 output ----
    lat4, w4, b4, pos4 = make_inputs(4, 4, 16, 16, 2, 32, jax.random.PRNGKey(1))
    ref4 = reference(lat4, w4, b4, pos4, 2, False)
    out4 = patch_embed_forward(lat4, w4, b4, pos4, patch_size=2, layer_norm=False,
                               compute_dtype=jnp.bfloat16, out_dtype=jnp.bfloat16,
                               max_rows_per_tile=128)   # -> TM=128 = 2 images/tile
    out4 = jax.block_until_ready(out4)
    assert out4.shape == (4, 64, 32) and out4.dtype == jnp.bfloat16
    np.testing.assert_allclose(np.asarray(out4, dtype=np.float32), np.asarray(ref4),
                               rtol=5e-2, atol=1e-1)

    # ---- 4) degenerate NP (7x7 = 49 patches): streamed-pos fallback ----
    lat7, w7, b7, pos7 = make_inputs(2, 4, 14, 14, 2, 32, jax.random.PRNGKey(2))
    ref7 = reference(lat7, w7, b7, pos7, 2, False)
    out7 = patch_embed_forward(lat7, w7, b7, pos7, patch_size=2, layer_norm=False,
                               compute_dtype=jnp.bfloat16)
    out7 = jax.block_until_ready(out7)
    assert out7.shape == (2, 49, 32)
    np.testing.assert_allclose(np.asarray(out7), np.asarray(ref7), rtol=5e-2, atol=5e-2)

    print("KERNEL_OK")
</pallas_src>

<mosaic_0001>
module attributes {stable_mosaic.version = 11 : i64} {
  func.func @kernel(%arg0: i32, %arg1: memref<64x16xbf16, #tpu.memory_space<vmem>>, %arg2: memref<16x32xbf16, #tpu.memory_space<vmem>>, %arg3: memref<64x32xbf16, #tpu.memory_space<vmem>>, %arg4: memref<64x32xf32, #tpu.memory_space<vmem>>) attributes {dimension_semantics = [#tpu.dimension_semantics<parallel>], iteration_bounds = array<i64: 2>, scalar_prefetch = 0 : i64, scratch_operands = 0 : i64, tpu.core_type = #tpu.core_type<tc>, window_params = [{transform_indices = @transform_0, window_bounds = array<i64: 64, 16>}, {pipeline_mode = #tpu.pipeline_mode<synchronous>, transform_indices = @transform_1, window_bounds = array<i64: 16, 32>}, {pipeline_mode = #tpu.pipeline_mode<synchronous>, transform_indices = @transform_2, window_bounds = array<i64: 64, 32>}, {transform_indices = @transform_3, window_bounds = array<i64: 64, 32>}]} {
    %c0 = arith.constant 0 : index
    %c0_0 = arith.constant 0 : index
    %0 = vector.load %arg1[%c0, %c0_0] : memref<64x16xbf16, #tpu.memory_space<vmem>>, vector<64x16xbf16>
    %c0_1 = arith.constant 0 : index
    %c0_2 = arith.constant 0 : index
    %1 = vector.load %arg2[%c0_1, %c0_2] : memref<16x32xbf16, #tpu.memory_space<vmem>>, vector<16x32xbf16>
    %cst = arith.constant dense<0.000000e+00> : vector<64x32xf32>
    %2 = tpu.matmul %0, %1, %cst {dimension_numbers = #tpu.dot_dimension_numbers<[1], [0], [0], [1], [0, 0, 1, 1], [], []>} : vector<64x16xbf16>, vector<16x32xbf16>, vector<64x32xf32> -> vector<64x32xf32>
    %c0_3 = arith.constant 0 : index
    %c0_4 = arith.constant 0 : index
    %3 = vector.load %arg3[%c0_3, %c0_4] : memref<64x32xbf16, #tpu.memory_space<vmem>>, vector<64x32xbf16>
    %4 = arith.extf %3 : vector<64x32xbf16> to vector<64x32xf32>
    %5 = arith.addf %2, %4 : vector<64x32xf32>
    %c0_5 = arith.constant 0 : index
    %c0_6 = arith.constant 0 : index
    %6 = vector.load %arg4[%c0_5, %c0_6] : memref<64x32xf32, #tpu.memory_space<vmem>>, vector<64x32xf32>
    tpu.vector_store %arg4[%c0_5, %c0_6], %5 {strides = array<i32>} : memref<64x32xf32, #tpu.memory_space<vmem>>, vector<64x32xf32>,
    return
  }
  func.func @transform_0(%arg0: i32) -> (i32, i32) {
    %c0_i32 = arith.constant 0 : i32
    %c0_i32_0 = arith.constant 0 : i32
    return %arg0, %c0_i32 : i32, i32
  }
  func.func @transform_1(%arg0: i32) -> (i32, i32) {
    %c0_i32 = arith.constant 0 : i32
    %c0_i32_0 = arith.constant 0 : i32
    %c0_i32_1 = arith.constant 0 : i32
    return %c0_i32, %c0_i32_0 : i32, i32
  }
  func.func @transform_2(%arg0: i32) -> (i32, i32) {
    %c0_i32 = arith.constant 0 : i32
    %c0_i32_0 = arith.constant 0 : i32
    %c0_i32_1 = arith.constant 0 : i32
    return %c0_i32, %c0_i32_0 : i32, i32
  }
  func.func @transform_3(%arg0: i32) -> (i32, i32) {
    %c0_i32 = arith.constant 0 : i32
    %c0_i32_0 = arith.constant 0 : i32
    return %arg0, %c0_i32 : i32, i32
  }
}

</mosaic_0001>

<bundles_post_ra>
// kernel: patch_embed_forward.1
= control target key start
LH: loop header
LB: loop body
LE: loop exit
PB: predicated region body
PF: predicated region fallthrough
CT: control target
= control target key end

     0   :  { %s432_s12 = smov 0   ;;  %s482_s0 = inlined_call_operand.vmem [shape: bf16[128,16], index: 0, kind: input, shape index: {}]   ;;  %s483_s1 = inlined_call_operand.vmem [shape: bf16[16,32], index: 1, kind: input, shape index: {}]   ;;  %s484_s2 = inlined_call_operand.vmem [shape: bf16[64,32], index: 2, kind: input, shape index: {}]   ;;  %s485_s3 = inlined_call_operand.vmem [shape: f32[128,32], index: 3, kind: output, shape index: {}]  }
   0x1 LB: > { %s334_s13 = sadd.s32 4294967295, %s410_s12   ;;  %p338_p0 = scmp.ge.s32.totalorder %s410_s12, 1  ;;  %s410_s12 = sphi %s432_s12, %s13_s12  }
   0x2   : > { %p138_p1 = scmp.lt.s32.totalorder %s410_s12, 3 }
   0x4   : > { %p139_p2 = pnand %p338_p0, %p138_p1 }
   0x5   : > { %s339_s16 = sshll.u32 (!%p139_p2), %s334_s13, 3 }
   0x6   : > { %142 = sbr.rel (%p139_p2) target bundleno = 160 (0xa0), region = 32  ;;  %p163_p3 = scmp.lt.s32.totalorder (!%p139_p2), %s339_s16, 15 }
   0xb   : > { %v373_v0 = vld [vmem:[%s483_s1] sm:$0xff]  ;;  %s487_s16 = smov (!%p163_p3, %s339_s16), 15  ;;  %vm227_vm0 = vcmask 130048   ;;  %v390_v6 = vld [vmem:[%s484_s2 + $0x8] sm:$0xff]   ;;  %vm269_vm1 = vcmask 261120   ;;  %v391_v13 = vld [vmem:[%s484_s2 + $0x10] sm:$0xff]  }
   0xc   : > { %247 = vmatpush.bf16.msra.mxu0 %v373_v0  ;;  %393 = vmatpush.bf16.msra.mxu1 %v373_v0  ;;  %s340_s17 = sshll.u32 %s487_s16, 2  ;;  %v375_v5 = vld [vmem:[%s484_s2] sm:$0xff]   ;;  %s342_s25 = sshll.u32 %s487_s16, 3  ;;  %v380_v8 = vunpack.c.l.bf16 %v390_v6  ;;  %v392_v14 = vld [vmem:[%s484_s2 + $0x18] sm:$0xff]   ;;  %v384_v15 = vunpack.c.l.bf16 %v391_v13  ;;  %v381_v18 = vunpack.c.h.bf16 %v390_v6  ;;  %v385_v27 = vunpack.c.h.bf16 %v391_v13 }
   0xd   : > { %394 = vmatpush.bf16.msra.mxu2 %v373_v0  ;;  %395 = vmatpush.bf16.msra.mxu3 %v373_v0  ;;  %s166_s20 = scalar_lea.vmem %s482_s0, %s340_s17  ;;  %v376_v7 = vunpack.c.l.bf16 %v375_v5  ;;  %s455_s28 = scalar_lea.vmem %s485_s3, %s342_s25  ;;  %v388_v16 = vunpack.c.l.bf16 %v392_v14  ;;  %v377_v17 = vunpack.c.h.bf16 %v375_v5  ;;  %v389_v28 = vunpack.c.h.bf16 %v392_v14 }
   0xe   : > { %v369_v1 = vld [vmem:[%s166_s20] sm:$0xff]  ;;  %v370_v2 = vld [vmem:[%s166_s20 + $0x8] sm:$0xff]  ;;  %v371_v3 = vld [vmem:[%s166_s20 + $0x10] sm:$0xff] }
   0xf   : > { %v372_v4 = vld [vmem:[%s166_s20 + $0x18] sm:$0xff]  ;;  %363 = vmatmul.msk.bf16.vlgmr.msra.gmra.mxu0 %vm227_vm0, %v369_v1  ;;  %364 = vmatmul.msk.bf16.vlgmr.msra.gmra.mxu1 %vm227_vm0, %v370_v2 }
  0x10   : > { %365 = vmatmul.msk.bf16.vlgmr.msra.gmra.mxu2 %vm227_vm0, %v371_v3  ;;  %366 = vmatmul.msk.bf16.vlgmr.msra.gmra.mxu3 %vm227_vm0, %v372_v4 }
  0x8c   : > { %v249_v9 = vpop.f32.mrf.mxu0  ;;  %v254_v10 = vpop.f32.mrf.mxu1 }
  0x8d   : > { %v250_v11 = vadd.f32 %v376_v7, %v249_v9  ;;  %v255_v12 = vadd.f32 %v380_v8, %v254_v10 }
  0x8f   : > { %270 = vst.msk [vmem:[%s455_s28] sm:$0xff] %vm269_vm1, %v250_v11 }
  0x90   : > { %272 = vst.msk [vmem:[%s455_s28 + $0x10] sm:$0xff] %vm269_vm1, %v255_v12 }
  0x93   : > { %v259_v19 = vpop.f32.mrf.mxu2  ;;  %v264_v20 = vpop.f32.mrf.mxu3 }
  0x94   : > { %v260_v21 = vadd.f32 %v384_v15, %v259_v19  ;;  %v265_v22 = vadd.f32 %v388_v16, %v264_v20  ;;  %v251_v23 = vpop.f32.mrf.mxu0  ;;  %v256_v24 = vpop.f32.mrf.mxu1 }
  0x95   : > { %v252_v25 = vadd.f32 %v377_v17, %v251_v23  ;;  %v257_v26 = vadd.f32 %v381_v18, %v256_v24 }
  0x96   : > { %274 = vst.msk [vmem:[%s455_s28 + $0x20] sm:$0xff] %vm269_vm1, %v260_v21 }
  0x97   : > { %276 = vst.msk [vmem:[%s455_s28 + $0x30] sm:$0xff] %vm269_vm1, %v265_v22 }
  0x98   : > { %271 = vst.msk [vmem:[%s455_s28 + $0x8] sm:$0xff] %vm269_vm1, %v252_v25 }
  0x99   : > { %273 = vst.msk [vmem:[%s455_s28 + $0x18] sm:$0xff] %vm269_vm1, %v257_v26 }
  0x9b   : > { %v261_v29 = vpop.f32.mrf.mxu2  ;;  %v266_v30 = vpop.f32.mrf.mxu3 }
  0x9c   : > { %v262_v31 = vadd.f32 %v385_v27, %v261_v29  ;;  %v267_v32 = vadd.f32 %v389_v28, %v266_v30 }
  0x9e   : > { %275 = vst.msk [vmem:[%s455_s28 + $0x28] sm:$0xff] %vm269_vm1, %v262_v31 }
  0x9f   : > { %277 = vst.msk [vmem:[%s455_s28 + $0x38] sm:$0xff] %vm269_vm1, %v267_v32 }
  0xa0 PF: > { %s13_s12 = sadd.s32 1, %s410_s12  }
  0xa1   : > { %p10_p4 = scmp.ge.s32.totalorder %s13_s12, 4  }
  0xa3   :  { %12 = sbr.rel (!%p10_p4) target bundleno = 1 (0x1), region = 62 }

</bundles_post_ra>
